<compile_context>
chip_gen: v7x
topology: tpu7x:2x2x1
jax: 0.10.0
libtpu: 0.0.40
codegen_flags: <defaults>
</compile_context>

<pallas_src>
import functools

import jax
import jax.numpy as jnp
from jax.experimental import pallas as pl
from jax.experimental.pallas import tpu as pltpu


def _distill_kl_kernel(ys_ref, yt_ref, out_ref, *, inv_t, n_valid, tile_n,
                       needs_row_mask):
    # Load tile; cast to f32 in-kernel (inputs may be bf16 in HBM).
    ys = ys_ref[...].astype(jnp.float32) * inv_t
    yt = yt_ref[...].astype(jnp.float32) * inv_t

    # Student: stable (max-shifted) log-sum-exp per row. log_p_s itself is
    # never materialized (its lse_s correction is folded into per-row math).
    ms = jnp.max(ys, axis=-1, keepdims=True)
    ys_sh = ys - ms
    lse_s = jnp.log(jnp.sum(jnp.exp(ys_sh), axis=-1, keepdims=True))

    # Teacher: un-normalized softmax weights; 1/sum_t is factored out of the
    # class sum instead of materializing p_t = et / sum_t.
    mt = jnp.max(yt, axis=-1, keepdims=True)
    yt_sh = yt - mt
    et = jnp.exp(yt_sh)
    sum_t = jnp.sum(et, axis=-1, keepdims=True)

    #   KL_row = sum_c p_t * (log p_t - log p_s)
    #          = (1/sum_t) * sum_c et*(yt_sh - ys_sh) + lse_s - log(sum_t)
    inner = jnp.sum(et * (yt_sh - ys_sh), axis=-1, keepdims=True)
    # Exact (non-approx) reciprocal: per-row only; keeps 1e-5 tolerance.
    kl_row = inner * pl.reciprocal(sum_t) + lse_s - jnp.log(sum_t)

    if needs_row_mask:
        # Ragged last tile reads past the end of the (unpadded) HBM array:
        # discard those rows with a select so NaN/Inf garbage cannot leak.
        row = (pl.program_id(0) * tile_n
               + jax.lax.broadcasted_iota(jnp.int32, (tile_n, 1), 0))
        kl_row = jnp.where(row < n_valid, kl_row, jnp.float32(0.0))

    partial = jnp.sum(kl_row)
    # Lane-dense unmasked store of the per-tile partial sum; the wrapper reads
    # element [i, 0, 0] of each block.
    out_ref[...] = jnp.broadcast_to(partial, out_ref.shape)


def _round_up(x, m):
    return ((x + m - 1) // m) * m


def _vmem_limit_bytes():
    """Generation-aware scoped-VMEM limit (48 MiB on v7x, 64 MiB otherwise)."""
    try:
        cap = pltpu.get_tpu_info().vmem_capacity_bytes
    except Exception:  # pragma: no cover - conservative fallback
        cap = 128 * 1024 * 1024
    if cap <= 64 * 1024 * 1024:          # v7x: 64 MiB physical per TC
        return 48 * 1024 * 1024
    return 64 * 1024 * 1024              # v5e / v6e: 128 MiB physical


def distill_kl(y_s, y_t, T, *, tile_n=None):
    """Pallas TPU implementation of DistillKL.forward. Returns scalar f32."""
    assert y_s.shape == y_t.shape and y_s.ndim == 2
    N, C = y_s.shape

    vmem_limit = _vmem_limit_bytes()

    if tile_n is None:
        # Largest multiple of 8 such that 2 inputs x 2 pipeline buffers plus
        # ~6 f32 full-tile temporaries fit ~75% of the scoped VMEM limit.
        # (Lanes are physically padded to 128 inside VMEM, so budget c_lanes.)
        c_lanes = _round_up(C, 128)
        itemsize = jnp.dtype(y_s.dtype).itemsize
        per_row = c_lanes * (4 * itemsize + 6 * 4)
        budget = int(vmem_limit * 0.75)
        tile_n = max(8, budget // per_row)
    tile_n = max(8, int(tile_n))
    tile_n -= tile_n % 8

    # Never a larger tile than the (8-rounded) batch itself.
    tile_n = min(tile_n, _round_up(N, 8))
    # Guarantee >= 2 grid steps so the 'parallel' axis shards across v7x's two
    # TensorCores (no measurable cost on single-TC v5e/v6e).
    if tile_n >= N and N > 8:
        tile_n = _round_up(pl.cdiv(N, 2), 8)

    num_tiles = pl.cdiv(N, tile_n)
    needs_row_mask = (num_tiles * tile_n) > N

    kernel = functools.partial(
        _distill_kl_kernel,
        inv_t=float(1.0 / T),
        n_valid=N,
        tile_n=tile_n,
        needs_row_mask=needs_row_mask,
    )

    partials = pl.pallas_call(
        kernel,
        out_shape=jax.ShapeDtypeStruct((num_tiles, 8, 128), jnp.float32),
        grid_spec=pltpu.PrefetchScalarGridSpec(
            num_scalar_prefetch=0,
            grid=(num_tiles,),
            in_specs=[
                # Last dim == full array dim C (no 128 padding, no HBM copy).
                pl.BlockSpec((tile_n, C), lambda i: (i, 0)),
                pl.BlockSpec((tile_n, C), lambda i: (i, 0)),
            ],
            out_specs=pl.BlockSpec((1, 8, 128), lambda i: (i, 0, 0)),
        ),
        compiler_params=pltpu.CompilerParams(
            dimension_semantics=("parallel",),
            vmem_limit_bytes=vmem_limit,
        ),
    )(y_s, y_t)

    total = jnp.sum(partials[:, 0, 0])
    return total * (float(T) * float(T)) / N


def distill_kl_ref(y_s, y_t, T):
    """Pure-JAX reference (mirrors the PyTorch module)."""
    log_p_s = jax.nn.log_softmax(y_s / T, axis=1)
    log_p_t = jax.nn.log_softmax(y_t / T, axis=1)
    p_t = jnp.exp(log_p_t)
    kl = jnp.sum(p_t * (log_p_t - log_p_s))
    return kl * T ** 2 / y_s.shape[0]


if __name__ == "__main__":
    key = jax.random.PRNGKey(0)
    T = 4.0
    k1, k2, k3, k4 = jax.random.split(key, 4)

    # Case 1: small classifier-like shapes; exercises the ragged class axis
    # (C=100, not a multiple of 128) and the ragged-batch row mask (6 -> 8).
    y_s1 = jax.random.normal(k1, (6, 100), dtype=jnp.float32)
    y_t1 = jax.random.normal(k2, (6, 100), dtype=jnp.float32)
    out1 = jax.block_until_ready(distill_kl(y_s1, y_t1, T))
    ref1 = distill_kl_ref(y_s1, y_t1, T)
    assert jnp.isfinite(out1), "loss contains NaN/Inf"   # mirrors if_contains_nan
    assert jnp.allclose(out1, ref1, rtol=1e-5, atol=1e-5), (out1, ref1)

    # Case 2: forced small tile -> multi-step 'parallel' grid with per-tile
    # partial sums (exercises the pipelined / megacore-friendly path) with a
    # non-divisible batch (30 rows over 8-row tiles -> ragged last tile).
    y_s2 = jax.random.normal(k3, (30, 256), dtype=jnp.float32)
    y_t2 = jax.random.normal(k4, (30, 256), dtype=jnp.float32)
    out2 = jax.block_until_ready(distill_kl(y_s2, y_t2, T, tile_n=8))
    ref2 = distill_kl_ref(y_s2, y_t2, T)
    assert jnp.isfinite(out2), "loss contains NaN/Inf"
    assert jnp.allclose(out2, ref2, rtol=1e-5, atol=1e-5), (out2, ref2)

    print("KERNEL_OK")
</pallas_src>

<mosaic_0001>
module attributes {stable_mosaic.version = 11 : i64} {
  func.func @_distill_kl_kernel(%arg0: i32, %arg1: memref<8x100xf32, #tpu.memory_space<vmem>>, %arg2: memref<8x100xf32, #tpu.memory_space<vmem>>, %arg3: memref<1x8x128xf32, #tpu.memory_space<vmem>>) attributes {dimension_semantics = [#tpu.dimension_semantics<parallel>], iteration_bounds = array<i64: 1>, scalar_prefetch = 0 : i64, scratch_operands = 0 : i64, tpu.core_type = #tpu.core_type<tc>, window_params = [{transform_indices = @transform_0, window_bounds = array<i64: 8, 100>}, {transform_indices = @transform_1, window_bounds = array<i64: 8, 100>}, {transform_indices = @transform_2, window_bounds = array<i64: 1, 8, 128>}]} {
    %c0 = arith.constant 0 : index
    %c0_0 = arith.constant 0 : index
    %0 = vector.load %arg1[%c0, %c0_0] : memref<8x100xf32, #tpu.memory_space<vmem>>, vector<8x100xf32>
    %cst = arith.constant 2.500000e-01 : f32
    %1 = vector.broadcast %cst : f32 to vector<8x100xf32>
    %2 = arith.mulf %0, %1 : vector<8x100xf32>
    %c0_1 = arith.constant 0 : index
    %c0_2 = arith.constant 0 : index
    %3 = vector.load %arg2[%c0_1, %c0_2] : memref<8x100xf32, #tpu.memory_space<vmem>>, vector<8x100xf32>
    %cst_3 = arith.constant 2.500000e-01 : f32
    %4 = vector.broadcast %cst_3 : f32 to vector<8x100xf32>
    %5 = arith.mulf %3, %4 : vector<8x100xf32>
    %cst_4 = arith.constant dense<0xFF800000> : vector<8xf32>
    %6 = vector.multi_reduction <maximumf>, %2, %cst_4 [1] : vector<8x100xf32> to vector<8xf32>
    %7 = vector.shape_cast %6 : vector<8xf32> to vector<8x1xf32>
    %8 = vector.broadcast %7 : vector<8x1xf32> to vector<8x100xf32>
    %9 = arith.subf %2, %8 : vector<8x100xf32>
    %10 = math.exp %9 : vector<8x100xf32>
    %cst_5 = arith.constant dense<0.000000e+00> : vector<8xf32>
    %11 = vector.multi_reduction <add>, %10, %cst_5 [1] : vector<8x100xf32> to vector<8xf32>
    %12 = vector.shape_cast %11 : vector<8xf32> to vector<8x1xf32>
    %13 = math.log %12 : vector<8x1xf32>
    %cst_6 = arith.constant dense<0xFF800000> : vector<8xf32>
    %14 = vector.multi_reduction <maximumf>, %5, %cst_6 [1] : vector<8x100xf32> to vector<8xf32>
    %15 = vector.shape_cast %14 : vector<8xf32> to vector<8x1xf32>
    %16 = vector.broadcast %15 : vector<8x1xf32> to vector<8x100xf32>
    %17 = arith.subf %5, %16 : vector<8x100xf32>
    %18 = math.exp %17 : vector<8x100xf32>
    %cst_7 = arith.constant dense<0.000000e+00> : vector<8xf32>
    %19 = vector.multi_reduction <add>, %18, %cst_7 [1] : vector<8x100xf32> to vector<8xf32>
    %20 = vector.shape_cast %19 : vector<8xf32> to vector<8x1xf32>
    %21 = arith.subf %17, %9 : vector<8x100xf32>
    %22 = arith.mulf %18, %21 : vector<8x100xf32>
    %cst_8 = arith.constant dense<0.000000e+00> : vector<8xf32>
    %23 = vector.multi_reduction <add>, %22, %cst_8 [1] : vector<8x100xf32> to vector<8xf32>
    %24 = vector.shape_cast %23 : vector<8xf32> to vector<8x1xf32>
    %25 = tpu.reciprocal %20 : vector<8x1xf32> -> vector<8x1xf32>
    %26 = arith.mulf %24, %25 : vector<8x1xf32>
    %27 = arith.addf %26, %13 : vector<8x1xf32>
    %28 = math.log %20 : vector<8x1xf32>
    %29 = arith.subf %27, %28 : vector<8x1xf32>
    %c8_i32 = arith.constant 8 : i32
    %30 = arith.muli %arg0, %c8_i32 : i32
    %31 = tpu.iota {dimensions = array<i32: 0>} : vector<8x1xi32>
    %32 = vector.broadcast %30 : i32 to vector<8x1xi32>
    %33 = arith.addi %32, %31 : vector<8x1xi32>
    %c6_i32 = arith.constant 6 : i32
    %34 = vector.broadcast %c6_i32 : i32 to vector<8x1xi32>
    %35 = arith.cmpi slt, %33, %34 : vector<8x1xi32>
    %cst_9 = arith.constant 0.000000e+00 : f32
    %36 = vector.broadcast %cst_9 : f32 to vector<8x1xf32>
    %37 = arith.select %35, %29, %36 : vector<8x1xi1>, vector<8x1xf32>
    %38 = vector.shape_cast %37 : vector<8x1xf32> to vector<1x8x1xf32>
    %cst_10 = arith.constant dense<0.000000e+00> : vector<1xf32>
    %39 = vector.multi_reduction <add>, %38, %cst_10 [1, 2] : vector<1x8x1xf32> to vector<1xf32>
    %40 = vector.shape_cast %39 : vector<1xf32> to vector<1x1x1xf32>
    %41 = vector.extract %40[0, 0, 0] : f32 from vector<1x1x1xf32>
    %42 = vector.broadcast %41 : f32 to vector<1x8x128xf32>
    %c0_11 = arith.constant 0 : index
    %c0_12 = arith.constant 0 : index
    %c0_13 = arith.constant 0 : index
    %43 = vector.load %arg3[%c0_11, %c0_12, %c0_13] : memref<1x8x128xf32, #tpu.memory_space<vmem>>, vector<1x8x128xf32>
    tpu.vector_store %arg3[%c0_11, %c0_12, %c0_13], %42 {strides = array<i32>} : memref<1x8x128xf32, #tpu.memory_space<vmem>>, vector<1x8x128xf32>,
    return
  }
  func.func @transform_0(%arg0: i32) -> (i32, i32) {
    %c0_i32 = arith.constant 0 : i32
    %c0_i32_0 = arith.constant 0 : i32
    return %arg0, %c0_i32 : i32, i32
  }
  func.func @transform_1(%arg0: i32) -> (i32, i32) {
    %c0_i32 = arith.constant 0 : i32
    %c0_i32_0 = arith.constant 0 : i32
    return %arg0, %c0_i32 : i32, i32
  }
  func.func @transform_2(%arg0: i32) -> (i32, i32, i32) {
    %c0_i32 = arith.constant 0 : i32
    %c0_i32_0 = arith.constant 0 : i32
    %c0_i32_1 = arith.constant 0 : i32
    return %arg0, %c0_i32, %c0_i32_0 : i32, i32, i32
  }
}

</mosaic_0001>

<bundles_post_ra>
// kernel: tpu_custom_call.1
= control target key start
LH: loop header
LB: loop body
LE: loop exit
PB: predicated region body
PF: predicated region fallthrough
CT: control target
= control target key end

     0   :  { %7 = vsyncpa [#allocation3], 0  ;;  %s254_s0 = inlined_call_operand.hbm [shape: f32[6,100], index: 0, kind: input, shape index: {}]   ;;  %s255_s1 = inlined_call_operand.hbm [shape: f32[6,100], index: 1, kind: input, shape index: {}]   ;;  %s256_s2 = inlined_call_operand.hbm [shape: f32[1,8,128], index: 2, kind: output, shape index: {}]  }
   0x1   :  { %8 = vsyncpa [#allocation6], 0 }
   0x2   :  { %9 = vsyncpa [#allocation4], 0  ;;  %s195_s9 = smov [#allocation2]   ;;  %s196_s11 = smov [#allocation5]  }
   0x3   :  { %s16_s10 = sshll.u32 %s195_s9, 4  ;;  %s26_s12 = sshll.u32 %s196_s11, 4  ;;  %s17_s10 = int_to_ptr.vmem [resolvable:$true] %s16_s10  ;;  %s27_s12 = int_to_ptr.vmem [resolvable:$true] %s26_s12 }
   0x4   :  { %s123_s15 = scalar_lea.hbm %s254_s0, 128 }
   0x5   :  { %p124_p0 = scmp.ne.s32.totalorder %s254_s0, %s123_s15  ;;  %p127_p1 = scmp.lt.u32.totalorder %s123_s15, %s254_s0 }
   0x7   :  { %p129_p2 = pnand %p127_p1, %p124_p0 }
   0x9   :  { %132 = shalt.err (!%p129_p2)
}
   0xa   :  { %s133_s20 = scalar_lea.vmem %s17_s10, 128  ;;  %p138_p4 = scmp.lt.s32.totalorder %s17_s10, %s17_s10 }
   0xb   :  { %p134_p3 = scmp.ne.s32.totalorder %s17_s10, %s133_s20  ;;  %p139_p5 = scmp.lt.s32.totalorder %s133_s20, %s133_s20 }
   0xd   :  { %p140_p6 = por %p139_p5, %p138_p4 }
   0xf   :  { %p141_p7 = pnand %p140_p6, %p134_p3 }
  0x11   :  { %144 = shalt.err (!%p141_p7)
}
  0x12   :  { %19 = dma.hbm_to_vmem [thread:$0]  %s254_s0, 128, %s17_s10, [#allocation3]  }
  0x13   :  { %s145_s25 = scalar_lea.hbm %s255_s1, 128 }
  0x14   :  { %p146_p8 = scmp.ne.s32.totalorder %s255_s1, %s145_s25  ;;  %p149_p9 = scmp.lt.u32.totalorder %s145_s25, %s255_s1 }
  0x16   :  { %p151_p10 = pnand %p149_p9, %p146_p8 }
  0x18   :  { %154 = shalt.err (!%p151_p10)
}
  0x19   :  { %s155_s30 = scalar_lea.vmem %s27_s12, 128  ;;  %p160_p12 = scmp.lt.s32.totalorder %s27_s12, %s27_s12 }
  0x1a   :  { %p156_p11 = scmp.ne.s32.totalorder %s27_s12, %s155_s30  ;;  %p161_p13 = scmp.lt.s32.totalorder %s155_s30, %s155_s30 }
  0x1c   :  { %p162_p0 = por %p161_p13, %p160_p12 }
  0x1e   :  { %p163_p1 = pnand %p162_p0, %p156_p11 }
  0x20   :  { %166 = shalt.err (!%p163_p1)
}
  0x21   :  { %29 = dma.hbm_to_vmem [thread:$0]  %s255_s1, 128, %s27_s12, [#allocation6]  }
  0x22   :  { %189 = dma.done.wait [#allocation3], 128  }
  0x23   :  { %190 = vsyncadd [#allocation3], 4294967168 }
  0x24   :  { %191 = dma.done.wait [#allocation6], 128  }
  0x25   :  { %192 = vsyncadd [#allocation6], 4294967168  ;;  %v36_v0 = vld [vmem:[#allocation2] sm:$0xff]  ;;  %vm40_vm0 = vcmask 818176   ;;  %v38_v1 = vld [vmem:[#allocation5] sm:$0xff]  ;;  %v73_v21 = vlaneseq  ;;  %vm79_vm2 = vcmask 7168  }
  0x26   :  { %v37_v2 = vmul.f32 0.25, %v36_v0  ;;  %v39_v3 = vmul.f32 0.25, %v38_v1  ;;  %s197_s1 = smov [#allocation7]  }
  0x27   :  { %v74_v25 = vshrl.u32 %v73_v21, 7  ;;  %s98_s4 = sshll.u32 %s197_s1, 4  ;;  %s99_s4 = int_to_ptr.vmem [resolvable:$true] %s98_s4 }
  0x28   :  { %v41_v4 = vsel %vm40_vm0, %v37_v2, -inf  ;;  %v52_v5 = vsel %vm40_vm0, %v39_v3, -inf  ;;  %s167_s6 = scalar_lea.vmem %s99_s4, 128  ;;  %p172_p3 = scmp.lt.s32.totalorder %s99_s4, %s99_s4 }
  0x29   :  { %42 = vmax.xlane.f32.xlu0 %v41_v4  ;;  %vm77_vm1 = vcmp.lt.s32.totalorder %v74_v25, 6  ;;  %p168_p2 = scmp.ne.s32.totalorder %s99_s4, %s167_s6  ;;  %p173_p4 = scmp.lt.s32.totalorder %s167_s6, %s167_s6 }
  0x2b   :  { %p174_p5 = por %p173_p4, %p172_p3 }
  0x2d   :  { %53 = vmax.xlane.f32.xlu0 %v52_v5  ;;  %p175_p6 = pnand %p174_p5, %p168_p2 }
  0xb6   :  { %v43_v6 = vpop.xlane.xlu0 %42 }
  0xb7   :  { %v44_v7 = vsub.f32 %v37_v2, %v43_v6 }
  0xb9   :  { %v45_v8 = vmul.f32 1.442695, %v44_v7 }
  0xba   :  { %v54_v9 = vpop.xlane.xlu0 %53 }
  0xbb   :  { %113 = vpow2.f32 %v45_v8  ;;  %v55_v10 = vsub.f32 %v39_v3, %v54_v9 }
  0xbd   :  { %v56_v11 = vmul.f32 1.442695, %v55_v10  ;;  %v61_v14 = vsub.f32 %v55_v10, %v44_v7 }
  0xbf   :  { %115 = vpow2.f32 %v56_v11 }
  0xc5   :  { %v114_v12 = vpop.eup %113 }
  0xc6   :  { %v47_v13 = vsel %vm40_vm0, %v114_v12, 0.0 }
  0xc7   :  { %48 = vadd.xlane.f32.xlu1 %v47_v13 }
  0xc9   :  { %v116_v15 = vpop.eup %115 }
  0xca   :  { %v58_v16 = vsel %vm40_vm0, %v116_v15, 0.0  ;;  %v62_v17 = vmul.f32 %v116_v15, %v61_v14 }
  0xcb   :  { %59 = vadd.xlane.f32.xlu1 %v58_v16 }
  0xcc   :  { %v63_v18 = vsel %vm40_vm0, %v62_v17, 0.0 }
  0xcd   :  { %64 = vadd.xlane.f32.xlu0 %v63_v18 }
 0x154   :  { %v49_v19 = vpop.xlane.xlu1 %48 }
 0x155   :  { %117 = vlog2.f32 %v49_v19 }
 0x158   :  { %v60_v20 = vpop.xlane.xlu1 %59 }
 0x159   :  { %119 = vrcp.f32 %v60_v20 }
 0x15a   :  { %121 = vlog2.f32 %v60_v20  ;;  %v65_v24 = vpop.xlane.xlu0 %64 }
 0x15f   :  { %v118_v22 = vpop.eup %117 }
 0x160   :  { %v51_v27 = vmul.f32 0.6931472, %v118_v22 }
 0x163   :  { %v120_v23 = vpop.eup %119 }
 0x164   :  { %v122_v26 = vpop.eup %121  ;;  %v67_v28 = vmul.f32 %v120_v23, %v65_v24 }
 0x165   :  { %v70_v29 = vmul.f32 0.6931472, %v122_v26 }
 0x166   :  { %v68_v30 = vadd.f32 %v67_v28, %v51_v27 }
 0x168   :  { %v71_v31 = vsub.f32 %v68_v30, %v70_v29 }
 0x16a   :  { %v78_v32 = vsel %vm77_vm1, %v71_v31, 0.0 }
 0x16b   :  { %v80_v33 = vsel %vm79_vm2, %v78_v32, 0.0 }
 0x16c   :  { %81 = vadd.xlane.f32.xlu1 %v80_v33 }
 0x1f9   :  { %v82_v34 = vpop.xlane.xlu1 %81 }
 0x1fa   :  { %v83_v35 = vrot.slane %v82_v34, 4 }
 0x1fc   :  { %v84_v36 = vadd.f32 %v83_v35, %v82_v34 }
 0x1fe   :  { %v85_v37 = vrot.slane %v84_v36, 2 }
 0x200   :  { %v86_v38 = vadd.f32 %v85_v37, %v84_v36 }
 0x202   :  { %v87_v39 = vrot.slane %v86_v38, 1 }
 0x204   :  { %v88_v40 = vadd.f32 %v87_v39, %v86_v38 }
 0x206   :  { %108 = vpush %v88_v40 }
 0x237   :  { %s109_s5 = spop %108 }
 0x238   :  { %v90_v41 = vstv %s109_s5 }
 0x239   :  { %91 = vst [vmem:[#allocation7] sm:$0xff] %v90_v41 }
 0x23a   :  { %178 = shalt.err (!%p175_p6)
}
 0x23b   :  { %s179_s9 = scalar_lea.hbm %s256_s2, 128 }
 0x23c   :  { %p180_p7 = scmp.ne.s32.totalorder %s256_s2, %s179_s9  ;;  %p183_p8 = scmp.lt.u32.totalorder %s179_s9, %s256_s2 }
 0x23e   :  { %p185_p9 = pnand %p183_p8, %p180_p7 }
 0x240   :  { %188 = shalt.err (!%p185_p9)
}
 0x241   :  { %101 = dma.vmem_to_hbm [thread:$0]  %s99_s4, 128, %s256_s2, [#allocation4]  }
 0x242   :  { %193 = dma.done.wait [#allocation4], 128  }
 0x243   :  { %194 = vsyncadd [#allocation4], 4294967168 }
 0x244   :  { %105 = vsyncpa [#allocation3], 1 }
 0x245   :  { %106 = vsyncpa [#allocation6], 1 }
 0x246   :  { %107 = vsyncpa [#allocation4], 1 }

</bundles_post_ra>
